<compile_context>
chip_gen: v6e
topology: v6e:2x2x1
jax: 0.10.0
libtpu: 0.0.40
codegen_flags: <defaults>
</compile_context>

<pallas_src>
import functools
import math

import jax
import jax.numpy as jnp
from jax.experimental import pallas as pl
from jax.experimental.pallas import tpu as pltpu

LANES = 128

_W_NONE, _W_ROW, _W_BLOCK, _W_FULL = 0, 1, 2, 3


def _cdiv(a, b):
    return -(-a // b)


def _lcm(a, b):
    return a * b // math.gcd(a, b)


def _sublane_align(dtype):
    # minimum sublane multiple for a packed dtype: f32 -> 8, bf16 -> 16, i8 -> 32
    return max(8, 32 // jnp.dtype(dtype).itemsize)


def _tpu_config():
    """(vmem_limit_bytes, ncores_split, max_block_rows) tuned per generation."""
    kind = ""
    try:
        kind = jax.devices()[0].device_kind.lower()
    except Exception:  # pragma: no cover - defensive only
        pass
    if "v7" in kind or "7x" in kind:
        # 64 MiB physical VMEM, 2 TensorCores per chip: smaller blocks, real split.
        return 48 * 1024 * 1024, 2, 8192
    if "v5" in kind or "v6" in kind:
        # 128 MiB physical VMEM, 1 TensorCore: go big.
        return 64 * 1024 * 1024, 1, 16384
    return 48 * 1024 * 1024, 1, 8192  # conservative default for unknown chips


def _bce_kernel(pred_ref, tgt_ref, *rest, ncores, valid_rows, lanes_last,
                inv_n, weight_mode, last_block):
    if weight_mode == _W_NONE:
        (out_ref,) = rest
        w_ref = None
    else:
        w_ref, out_ref = rest

    if ncores > 1:
        c = pl.program_id(0)
        i = pl.program_id(1)
        steps = pl.num_programs(1)
        gidx = c * steps + i
    else:
        i = pl.program_id(0)
        steps = pl.num_programs(0)
        gidx = i

    @pl.when(i == 0)
    def _():
        out_ref[...] = jnp.zeros_like(out_ref)

    block_rows = pred_ref.shape[0]

    p = pred_ref[...].astype(jnp.float32)
    t = tgt_ref[...].astype(jnp.float32)

    # PyTorch BCELoss clamps each log term at -100.
    neg_hundred = jnp.float32(-100.0)
    log_p = jnp.maximum(jnp.log(p), neg_hundred)
    log_1mp = jnp.maximum(jnp.log(1.0 - p), neg_hundred)
    # -(t*log_p + (1-t)*log_1mp) == -(log_1mp + t*(log_p - log_1mp)): one fewer mul.
    per_elem = -(log_1mp + t * (log_p - log_1mp))

    if weight_mode in (_W_BLOCK, _W_FULL):
        per_elem = per_elem * w_ref[...]

    def _accumulate(v):
        out_ref[...] += v.reshape(-1, 8, LANES).sum(axis=0).reshape(out_ref.shape)

    # Interior blocks are fully valid: plain VPU accumulate, no mask cost.
    @pl.when(gidx < last_block)
    def _():
        _accumulate(per_elem)

    # Only the logically-last block (and clamped duplicate blocks from the
    # two-core split) pays for the iota mask; invalid data contributes 0.
    @pl.when(gidx >= last_block)
    def _():
        row_ids = jax.lax.broadcasted_iota(jnp.int32, (block_rows, LANES), 0)
        col_ids = jax.lax.broadcasted_iota(jnp.int32, (block_rows, LANES), 1)
        grow = gidx * block_rows + row_ids
        mask = (grow < valid_rows - 1) | (
            (grow == valid_rows - 1) & (col_ids < lanes_last))
        _accumulate(jnp.where(mask, per_elem, jnp.float32(0.0)))

    @pl.when(i == steps - 1)
    def _():
        total = out_ref[...]
        if weight_mode == _W_ROW:
            # lane-periodic weight: applied once to the folded accumulator.
            total = total * w_ref[...]
        out_ref[...] = total * jnp.float32(inv_n)


def _to_slab(flat, slab_rows):
    total = slab_rows * LANES
    if flat.shape[0] != total:
        # Only triggers for ragged n (not a multiple of 128) or tiny inputs.
        flat = jnp.pad(flat, (0, total - flat.shape[0]))
    return flat.reshape(slab_rows, LANES)


def bce_loss(pred, target, weight=None):
    """Mean binary cross-entropy matching nn.BCELoss(weight=weight)(pred, target)."""
    n = pred.size
    pred_flat = pred.reshape(-1)
    target_flat = target.reshape(-1)   # mirrors target.view(-1) when shapes differ
    last_dim = pred.shape[-1] if pred.ndim >= 1 else 1

    vmem_limit, ncores, max_rows = _tpu_config()
    align = max(_sublane_align(pred.dtype), _sublane_align(target.dtype))

    # ---- weight classification --------------------------------------------
    weight_mode = _W_NONE
    p_rows = 1
    w = None
    if weight is not None:
        w = jnp.asarray(weight, jnp.float32)
        if w.ndim == 1 and w.shape[0] == last_dim and last_dim > 0:
            p_rows = last_dim // math.gcd(last_dim, LANES)   # weight row period
            if p_rows == 1:
                weight_mode = _W_ROW
            elif _lcm(p_rows, align) <= max_rows:
                weight_mode = _W_BLOCK
            else:
                weight_mode = _W_FULL
        else:
            weight_mode = _W_FULL

    # ---- tiling -------------------------------------------------------------
    valid_rows = _cdiv(n, LANES)
    lanes_last = n - (valid_rows - 1) * LANES

    # VMEM budget -> block rows (streams are double-buffered by Pallas).
    row_bytes = LANES * (pred.dtype.itemsize + target.dtype.itemsize) * 2
    if weight_mode in (_W_BLOCK, _W_FULL):
        row_bytes += LANES * 4 * 2
    budget_rows = max(align, int(0.75 * vmem_limit) // row_bytes)
    budget_rows = min(budget_rows, max_rows)

    mult = _lcm(p_rows, align) if weight_mode == _W_BLOCK else align
    needed_rows = _cdiv(valid_rows, mult) * mult
    block_rows = min(max(mult, (budget_rows // mult) * mult), needed_rows)

    slab_rows = max(valid_rows, block_rows)
    total_blocks = _cdiv(slab_rows, block_rows)
    steps = _cdiv(total_blocks, ncores)
    last_block = total_blocks - 1

    pred2d = _to_slab(pred_flat, slab_rows)
    tgt2d = _to_slab(target_flat, slab_rows)

    # ---- weight operands ----------------------------------------------------
    w_args = []
    if weight_mode == _W_ROW:
        w_args = [jnp.broadcast_to(jnp.tile(w, LANES // last_dim), (8, LANES))]
    elif weight_mode == _W_BLOCK:
        reps = block_rows * LANES // last_dim
        w_args = [jnp.tile(w, reps).reshape(block_rows, LANES)]
    elif weight_mode == _W_FULL:
        w_full = jnp.broadcast_to(w, pred.shape).reshape(-1)
        w_args = [_to_slab(w_full, slab_rows)]

    # ---- grid / specs -------------------------------------------------------
    if ncores > 1:
        grid = (ncores, steps)
        semantics = (pltpu.CORE_PARALLEL, pltpu.ARBITRARY)
        # clamp so over-partitioned cores never DMA out of bounds; the gated
        # in-kernel mask (driven by the logical index) zeroes their contribution.
        stream_map = lambda c, i: (jnp.minimum(c * steps + i, last_block), 0)
        const_map = lambda c, i: (0, 0)
        out_map = lambda c, i: (c, 0, 0)
    else:
        grid = (steps,)
        semantics = (pltpu.ARBITRARY,)
        stream_map = lambda i: (i, 0)
        const_map = lambda i: (0, 0)
        out_map = lambda i: (0, 0, 0)

    stream_spec = pl.BlockSpec((block_rows, LANES), stream_map)
    in_specs = [stream_spec, stream_spec]
    args = [pred2d, tgt2d]
    if weight_mode == _W_ROW:
        in_specs.append(pl.BlockSpec((8, LANES), const_map))
        args += w_args
    elif weight_mode == _W_BLOCK:
        in_specs.append(pl.BlockSpec((block_rows, LANES), const_map))
        args += w_args
    elif weight_mode == _W_FULL:
        in_specs.append(stream_spec)
        args += w_args

    kernel = functools.partial(
        _bce_kernel,
        ncores=ncores,
        valid_rows=valid_rows,
        lanes_last=lanes_last,
        inv_n=1.0 / float(n),
        weight_mode=weight_mode,
        last_block=last_block,
    )

    partials = pl.pallas_call(
        kernel,
        out_shape=jax.ShapeDtypeStruct((ncores, 8, LANES), jnp.float32),
        grid_spec=pltpu.PrefetchScalarGridSpec(
            num_scalar_prefetch=0,
            grid=grid,
            in_specs=in_specs,
            out_specs=pl.BlockSpec((1, 8, LANES), out_map),
        ),
        compiler_params=pltpu.CompilerParams(
            dimension_semantics=semantics,
            vmem_limit_bytes=vmem_limit,
        ),
    )(*args)

    # per-core partials are already scaled by 1/n; tiny final reduce here.
    loss = jnp.sum(partials)
    loss_dict = {"BCE": loss}
    return loss, loss_dict


def _reference(pred, target, weight=None):
    pred = pred.astype(jnp.float32)
    target = target.reshape(pred.shape).astype(jnp.float32)
    lp = jnp.maximum(jnp.log(pred), -100.0)
    l1p = jnp.maximum(jnp.log(1.0 - pred), -100.0)
    loss = -(target * lp + (1.0 - target) * l1p)
    if weight is not None:
        loss = loss * jnp.broadcast_to(jnp.asarray(weight, jnp.float32), pred.shape)
    return jnp.mean(loss)


if __name__ == "__main__":
    key = jax.random.PRNGKey(0)
    k1, k2, k3, k4 = jax.random.split(key, 4)

    # Test 1: NCHW f32 probabilities + per-last-dim weight (W=16 | 128 -> _W_ROW).
    N, C, H, W = 2, 4, 16, 16
    pred = jax.nn.sigmoid(jax.random.normal(k1, (N, C, H, W), jnp.float32))
    target = (jax.random.uniform(k2, (N, C, H, W)) > 0.5).astype(jnp.float32)
    weight = 1.0 + 0.1 * jnp.arange(W, dtype=jnp.float32) / W

    loss1, _ = bce_loss(pred, target, weight=weight)
    loss1 = jax.block_until_ready(loss1)
    ref1 = _reference(pred, target, weight=weight)
    assert jnp.allclose(loss1, ref1, rtol=1e-5, atol=1e-6), (loss1, ref1)

    # Test 2: no weight (two-input variant).
    loss2, _ = bce_loss(pred, target)
    loss2 = jax.block_until_ready(loss2)
    ref2 = _reference(pred, target)
    assert jnp.allclose(loss2, ref2, rtol=1e-5, atol=1e-6), (loss2, ref2)

    # Test 3: ragged size (945 elems), bf16 preds, int targets, non-divisible
    # last dim -> resident periodic weight tile (_W_BLOCK) + gated tail mask.
    shape3 = (3, 5, 7, 9)
    pred3 = jax.nn.sigmoid(jax.random.normal(k3, shape3, jnp.float32)).astype(jnp.bfloat16)
    target3 = (jax.random.uniform(k4, shape3) > 0.5).astype(jnp.int32)
    weight3 = 0.5 + jnp.arange(shape3[-1], dtype=jnp.float32) / shape3[-1]

    loss3, _ = bce_loss(pred3, target3, weight=weight3)
    loss3 = jax.block_until_ready(loss3)
    ref3 = _reference(pred3, target3, weight=weight3)
    assert jnp.allclose(loss3, ref3, rtol=1e-5, atol=1e-6), (loss3, ref3)

    # Test 4: general broadcastable weight (per-channel (C,1,1)) -> streamed
    # _W_FULL fallback path.
    weight4 = (0.5 + jnp.arange(C, dtype=jnp.float32)).reshape(C, 1, 1)
    loss4, _ = bce_loss(pred, target, weight=weight4)
    loss4 = jax.block_until_ready(loss4)
    ref4 = _reference(pred, target, weight=weight4)
    assert jnp.allclose(loss4, ref4, rtol=1e-5, atol=1e-6), (loss4, ref4)

    print("KERNEL_OK")
</pallas_src>

<mosaic_0001>
module attributes {stable_mosaic.version = 11 : i64} {
  func.func @_bce_kernel(%arg0: i32, %arg1: memref<16x128xf32, #tpu.memory_space<vmem>>, %arg2: memref<16x128xf32, #tpu.memory_space<vmem>>, %arg3: memref<8x128xf32, #tpu.memory_space<vmem>>, %arg4: memref<1x8x128xf32, #tpu.memory_space<vmem>>) attributes {dimension_semantics = [#tpu.dimension_semantics<arbitrary>], iteration_bounds = array<i64: 1>, scalar_prefetch = 0 : i64, scratch_operands = 0 : i64, tpu.core_type = #tpu.core_type<tc>, window_params = [{transform_indices = @transform_0, window_bounds = array<i64: 16, 128>}, {transform_indices = @transform_1, window_bounds = array<i64: 16, 128>}, {pipeline_mode = #tpu.pipeline_mode<synchronous>, transform_indices = @transform_2, window_bounds = array<i64: 8, 128>}, {pipeline_mode = #tpu.pipeline_mode<synchronous>, transform_indices = @transform_3, window_bounds = array<i64: 1, 8, 128>}]} {
    %c0_i32 = arith.constant 0 : i32
    %0 = arith.cmpi eq, %arg0, %c0_i32 : i32
    %1 = arith.extui %0 : i1 to i32
    %c0_i32_0 = arith.constant 0 : i32
    %2 = arith.cmpi ne, %1, %c0_i32_0 : i32
    scf.if %2 {
      %cst_13 = arith.constant 0.000000e+00 : f32
      %27 = vector.broadcast %cst_13 : f32 to vector<1x8x128xf32>
      %c0_14 = arith.constant 0 : index
      %c0_15 = arith.constant 0 : index
      %c0_16 = arith.constant 0 : index
      %28 = vector.load %arg4[%c0_14, %c0_15, %c0_16] : memref<1x8x128xf32, #tpu.memory_space<vmem>>, vector<1x8x128xf32>
      tpu.vector_store %arg4[%c0_14, %c0_15, %c0_16], %27 {strides = array<i32>} : memref<1x8x128xf32, #tpu.memory_space<vmem>>, vector<1x8x128xf32>,
    } else {
    }
    %c0 = arith.constant 0 : index
    %c0_1 = arith.constant 0 : index
    %3 = vector.load %arg1[%c0, %c0_1] : memref<16x128xf32, #tpu.memory_space<vmem>>, vector<16x128xf32>
    %c0_2 = arith.constant 0 : index
    %c0_3 = arith.constant 0 : index
    %4 = vector.load %arg2[%c0_2, %c0_3] : memref<16x128xf32, #tpu.memory_space<vmem>>, vector<16x128xf32>
    %5 = math.log %3 : vector<16x128xf32>
    %cst = arith.constant -1.000000e+02 : f32
    %6 = vector.broadcast %cst : f32 to vector<16x128xf32>
    %7 = arith.maximumf %5, %6 : vector<16x128xf32>
    %cst_4 = arith.constant 1.000000e+00 : f32
    %8 = vector.broadcast %cst_4 : f32 to vector<16x128xf32>
    %9 = arith.subf %8, %3 : vector<16x128xf32>
    %10 = math.log %9 : vector<16x128xf32>
    %cst_5 = arith.constant -1.000000e+02 : f32
    %11 = vector.broadcast %cst_5 : f32 to vector<16x128xf32>
    %12 = arith.maximumf %10, %11 : vector<16x128xf32>
    %13 = arith.subf %7, %12 : vector<16x128xf32>
    %14 = arith.mulf %4, %13 : vector<16x128xf32>
    %15 = arith.addf %12, %14 : vector<16x128xf32>
    %cst_6 = arith.constant 0.000000e+00 : f32
    %16 = vector.broadcast %cst_6 : f32 to vector<16x128xf32>
    %17 = arith.subf %16, %15 : vector<16x128xf32>
    %c0_i32_7 = arith.constant 0 : i32
    %18 = arith.cmpi slt, %arg0, %c0_i32_7 : i32
    %19 = arith.extui %18 : i1 to i32
    %c0_i32_8 = arith.constant 0 : i32
    %20 = arith.cmpi ne, %19, %c0_i32_8 : i32
    scf.if %20 {
      %c0_13 = arith.constant 0 : index
      %c0_14 = arith.constant 0 : index
      %c0_15 = arith.constant 0 : index
      %27 = vector.load %arg4[%c0_13, %c0_14, %c0_15] : memref<1x8x128xf32, #tpu.memory_space<vmem>>, vector<1x8x128xf32>
      %28 = vector.shape_cast %17 : vector<16x128xf32> to vector<2x8x128xf32>
      %cst_16 = arith.constant dense<0.000000e+00> : vector<8x128xf32>
      %29 = vector.multi_reduction <add>, %28, %cst_16 [0] : vector<2x8x128xf32> to vector<8x128xf32>
      %30 = vector.shape_cast %29 : vector<8x128xf32> to vector<1x8x128xf32>
      %31 = arith.addf %27, %30 : vector<1x8x128xf32>
      %c0_17 = arith.constant 0 : index
      %c0_18 = arith.constant 0 : index
      %c0_19 = arith.constant 0 : index
      %32 = vector.load %arg4[%c0_17, %c0_18, %c0_19] : memref<1x8x128xf32, #tpu.memory_space<vmem>>, vector<1x8x128xf32>
      tpu.vector_store %arg4[%c0_17, %c0_18, %c0_19], %31 {strides = array<i32>} : memref<1x8x128xf32, #tpu.memory_space<vmem>>, vector<1x8x128xf32>,
    } else {
    }
    %c0_i32_9 = arith.constant 0 : i32
    %21 = arith.cmpi sge, %arg0, %c0_i32_9 : i32
    %22 = arith.extui %21 : i1 to i32
    %c0_i32_10 = arith.constant 0 : i32
    %23 = arith.cmpi ne, %22, %c0_i32_10 : i32
    scf.if %23 {
      %27 = tpu.iota {dimensions = array<i32: 0>} : vector<16x128xi32>
      %28 = tpu.iota {dimensions = array<i32: 1>} : vector<16x128xi32>
      %c16_i32 = arith.constant 16 : i32
      %29 = arith.muli %arg0, %c16_i32 : i32
      %30 = vector.broadcast %29 : i32 to vector<16x128xi32>
      %31 = arith.addi %30, %27 : vector<16x128xi32>
      %c15_i32 = arith.constant 15 : i32
      %32 = vector.broadcast %c15_i32 : i32 to vector<16x128xi32>
      %33 = arith.cmpi slt, %31, %32 : vector<16x128xi32>
      %c15_i32_13 = arith.constant 15 : i32
      %34 = vector.broadcast %c15_i32_13 : i32 to vector<16x128xi32>
      %35 = arith.cmpi eq, %31, %34 : vector<16x128xi32>
      %c128_i32 = arith.constant 128 : i32
      %36 = vector.broadcast %c128_i32 : i32 to vector<16x128xi32>
      %37 = arith.cmpi slt, %28, %36 : vector<16x128xi32>
      %38 = arith.andi %35, %37 : vector<16x128xi1>
      %39 = arith.ori %33, %38 : vector<16x128xi1>
      %cst_14 = arith.constant 0.000000e+00 : f32
      %40 = vector.broadcast %cst_14 : f32 to vector<16x128xf32>
      %41 = arith.select %39, %17, %40 : vector<16x128xi1>, vector<16x128xf32>
      %c0_15 = arith.constant 0 : index
      %c0_16 = arith.constant 0 : index
      %c0_17 = arith.constant 0 : index
      %42 = vector.load %arg4[%c0_15, %c0_16, %c0_17] : memref<1x8x128xf32, #tpu.memory_space<vmem>>, vector<1x8x128xf32>
      %43 = vector.shape_cast %41 : vector<16x128xf32> to vector<2x8x128xf32>
      %cst_18 = arith.constant dense<0.000000e+00> : vector<8x128xf32>
      %44 = vector.multi_reduction <add>, %43, %cst_18 [0] : vector<2x8x128xf32> to vector<8x128xf32>
      %45 = vector.shape_cast %44 : vector<8x128xf32> to vector<1x8x128xf32>
      %46 = arith.addf %42, %45 : vector<1x8x128xf32>
      %c0_19 = arith.constant 0 : index
      %c0_20 = arith.constant 0 : index
      %c0_21 = arith.constant 0 : index
      %47 = vector.load %arg4[%c0_19, %c0_20, %c0_21] : memref<1x8x128xf32, #tpu.memory_space<vmem>>, vector<1x8x128xf32>
      tpu.vector_store %arg4[%c0_19, %c0_20, %c0_21], %46 {strides = array<i32>} : memref<1x8x128xf32, #tpu.memory_space<vmem>>, vector<1x8x128xf32>,
    } else {
    }
    %c0_i32_11 = arith.constant 0 : i32
    %24 = arith.cmpi eq, %arg0, %c0_i32_11 : i32
    %25 = arith.extui %24 : i1 to i32
    %c0_i32_12 = arith.constant 0 : i32
    %26 = arith.cmpi ne, %25, %c0_i32_12 : i32
    scf.if %26 {
      %c0_13 = arith.constant 0 : index
      %c0_14 = arith.constant 0 : index
      %c0_15 = arith.constant 0 : index
      %27 = vector.load %arg4[%c0_13, %c0_14, %c0_15] : memref<1x8x128xf32, #tpu.memory_space<vmem>>, vector<1x8x128xf32>
      %c0_16 = arith.constant 0 : index
      %c0_17 = arith.constant 0 : index
      %28 = vector.load %arg3[%c0_16, %c0_17] : memref<8x128xf32, #tpu.memory_space<vmem>>, vector<8x128xf32>
      %29 = vector.shape_cast %28 : vector<8x128xf32> to vector<1x8x128xf32>
      %30 = arith.mulf %27, %29 : vector<1x8x128xf32>
      %cst_18 = arith.constant 4.8828125E-4 : f32
      %31 = vector.broadcast %cst_18 : f32 to vector<1x8x128xf32>
      %32 = arith.mulf %30, %31 : vector<1x8x128xf32>
      %c0_19 = arith.constant 0 : index
      %c0_20 = arith.constant 0 : index
      %c0_21 = arith.constant 0 : index
      %33 = vector.load %arg4[%c0_19, %c0_20, %c0_21] : memref<1x8x128xf32, #tpu.memory_space<vmem>>, vector<1x8x128xf32>
      tpu.vector_store %arg4[%c0_19, %c0_20, %c0_21], %32 {strides = array<i32>} : memref<1x8x128xf32, #tpu.memory_space<vmem>>, vector<1x8x128xf32>,
    } else {
    }
    return
  }
  func.func @transform_0(%arg0: i32) -> (i32, i32) {
    %c0_i32 = arith.constant 0 : i32
    %c0_i32_0 = arith.constant 0 : i32
    return %arg0, %c0_i32 : i32, i32
  }
  func.func @transform_1(%arg0: i32) -> (i32, i32) {
    %c0_i32 = arith.constant 0 : i32
    %c0_i32_0 = arith.constant 0 : i32
    return %arg0, %c0_i32 : i32, i32
  }
  func.func @transform_2(%arg0: i32) -> (i32, i32) {
    %c0_i32 = arith.constant 0 : i32
    %c0_i32_0 = arith.constant 0 : i32
    %c0_i32_1 = arith.constant 0 : i32
    return %c0_i32, %c0_i32_0 : i32, i32
  }
  func.func @transform_3(%arg0: i32) -> (i32, i32, i32) {
    %c0_i32 = arith.constant 0 : i32
    %c0_i32_0 = arith.constant 0 : i32
    %c0_i32_1 = arith.constant 0 : i32
    %c0_i32_2 = arith.constant 0 : i32
    return %c0_i32, %c0_i32_0, %c0_i32_1 : i32, i32, i32
  }
}

</mosaic_0001>

<bundles_post_ra>
// kernel: tpu_custom_call.1
= control target key start
LH: loop header
LB: loop body
LE: loop exit
PB: predicated region body
PF: predicated region fallthrough
CT: control target
= control target key end

     0   :  { %8 = vsyncpa [#allocation3], 0  ;;  %s284_s0 = inlined_call_operand.hbm [shape: f32[16,128], index: 0, kind: input, shape index: {}]   ;;  %s285_s1 = inlined_call_operand.hbm [shape: f32[16,128], index: 1, kind: input, shape index: {}]   ;;  %s286_s2 = inlined_call_operand.hbm [shape: f32[8,128], index: 2, kind: input, shape index: {}]   ;;  %s287_s3 = inlined_call_operand.hbm [shape: f32[1,8,128], index: 3, kind: output, shape index: {}]  }
   0x1   :  { %9 = vsyncpa [#allocation6], 0 }
   0x2   :  { %10 = vsyncpa [#allocation4], 0  ;;  %s246_s12 = smov [#allocation5]   ;;  %s247_s14 = smov [#allocation2]  }
   0x3   :  { %s28_s13 = sshll.u32 %s246_s12, 4  ;;  %s16_s15 = sshll.u32 %s247_s14, 4  ;;  %s29_s13 = int_to_ptr.vmem [resolvable:$true] %s28_s13  ;;  %s17_s15 = int_to_ptr.vmem [resolvable:$true] %s16_s15 }
   0x4   :  { %s168_s16 = scalar_lea.vmem %s29_s13, 256  ;;  %p173_p1 = scmp.lt.s32.totalorder %s29_s13, %s29_s13 }
   0x5   :  { %p169_p0 = scmp.ne.s32.totalorder %s29_s13, %s168_s16  ;;  %p174_p2 = scmp.lt.s32.totalorder %s168_s16, %s168_s16 }
   0x7   :  { %p175_p3 = por %p174_p2, %p173_p1 }
   0x9   :  { %p176_p4 = pnand %p175_p3, %p169_p0 }
   0xb   :  { %179 = shalt.err (!%p176_p4)
}
   0xc   :  { %s248_s17 = smov 128   ;;  %s249_s18 = smov 8  }
   0xd   :  { %34 = dma.hbm_to_vmem [thread:$0]  %s285_s1, 256, %s29_s13, [#allocation6], %s248_s17, %s248_s17, %s249_s18  }
   0xe   :  { %s188_s21 = scalar_lea.vmem %s17_s15, 256  ;;  %p193_p6 = scmp.lt.s32.totalorder %s17_s15, %s17_s15 }
   0xf   :  { %p189_p5 = scmp.ne.s32.totalorder %s17_s15, %s188_s21  ;;  %p194_p7 = scmp.lt.s32.totalorder %s188_s21, %s188_s21 }
  0x11   :  { %p195_p8 = por %p194_p7, %p193_p6 }
  0x13   :  { %p196_p9 = pnand %p195_p8, %p189_p5 }
  0x15   :  { %199 = shalt.err (!%p196_p9)
}
  0x16   :  { %22 = dma.hbm_to_vmem [thread:$0]  %s284_s0, 256, %s17_s15, [#allocation3], %s248_s17, %s248_s17, %s249_s18  }
  0x17   :  { %s250_s24 = smov [#allocation7]  }
  0x18   :  { %s41_s25 = sshll.u32 %s250_s24, 4  ;;  %s42_s25 = int_to_ptr.vmem [resolvable:$true] %s41_s25 }
  0x19   :  { %s208_s26 = scalar_lea.vmem %s42_s25, 128  ;;  %p213_p11 = scmp.lt.s32.totalorder %s42_s25, %s42_s25 }
  0x1a   :  { %p209_p10 = scmp.ne.s32.totalorder %s42_s25, %s208_s26  ;;  %p214_p12 = scmp.lt.s32.totalorder %s208_s26, %s208_s26 }
  0x1c   :  { %p215_p13 = por %p214_p12, %p213_p11 }
  0x1e   :  { %p216_p0 = pnand %p215_p13, %p209_p10 }
  0x20   :  { %219 = shalt.err (!%p216_p0)
}
  0x21   :  { %44 = dma.hbm_to_vmem [thread:$0]  %s286_s2, 128, %s42_s25, [#allocation6]  }
  0x22   :  { %240 = dma.done.wait [#allocation3], 256  }
  0x23   :  { %241 = vsyncadd [#allocation3], 4294967040 }
  0x24   :  { %242 = dma.done.wait [#allocation6], 384  }
  0x25   :  { %243 = vsyncadd [#allocation6], 4294966912  ;;  %v59_v0 = vld [vmem:[#allocation2] sm:$0xff]  ;;  %v60_v1 = vld [vmem:[#allocation2 + $0x8] sm:$0xff]  ;;  %v97_v4 = vlaneseq  ;;  %s251_s0 = smov [#allocation8]  }
  0x26   :  { %152 = vlog2.f32 %v59_v0  ;;  %v69_v2 = vsub.f32 1.0, %v59_v0  ;;  %v70_v3 = vsub.f32 1.0, %v60_v1  ;;  %v61_v17 = vld [vmem:[#allocation5] sm:$0xff]  ;;  %v62_v20 = vld [vmem:[#allocation5 + $0x8] sm:$0xff]  ;;  %v125_v31 = vld [vmem:[#allocation7] sm:$0xff]  ;;  %s135_s2 = sshll.u32 %s251_s0, 4  ;;  %s136_s2 = int_to_ptr.vmem [resolvable:$true] %s135_s2 }
  0x27   :  { %154 = vlog2.f32 %v60_v1  ;;  %v98_v10 = vshrl.u32 %v97_v4, 7  ;;  %s220_s28 = scalar_lea.vmem %s136_s2, 128  ;;  %p225_p2 = scmp.lt.s32.totalorder %s136_s2, %s136_s2 }
  0x28   :  { %156 = vlog2.f32 %v69_v2  ;;  %p221_p1 = scmp.ne.s32.totalorder %s136_s2, %s220_s28  ;;  %p226_p3 = scmp.lt.s32.totalorder %s220_s28, %s220_s28 }
  0x29   :  { %158 = vlog2.f32 %v70_v3  ;;  %v99_v19 = vadd.s32 8, %v98_v10 }
  0x2a   :  { %p227_p4 = por %p226_p3, %p225_p2 }
  0x2b   :  { %vm107_vm0 = vcmp.lt.s32.totalorder %v99_v19, 15  ;;  %vm109_vm1 = vcmp.eq.s32.totalorder %v99_v19, 15 }
  0x2c   :  { %vm114_vm2 = vmor %vm107_vm0, %vm109_vm1  ;;  %p228_p5 = pnand %p227_p4, %p221_p1 }
  0x33   :  { %v153_v5 = vpop.eup %152 }
  0x34   :  { %v155_v6 = vpop.eup %154  ;;  %v64_v7 = vmul.f32 0.6931472, %v153_v5 }
  0x35   :  { %v157_v8 = vpop.eup %156  ;;  %v66_v9 = vmul.f32 0.6931472, %v155_v6 }
  0x36   :  { %v159_v11 = vpop.eup %158  ;;  %v67_v12 = vmax.f32 %v64_v7, -100.0  ;;  %v72_v13 = vmul.f32 0.6931472, %v157_v8 }
  0x37   :  { %v68_v14 = vmax.f32 %v66_v9, -100.0  ;;  %v74_v15 = vmul.f32 0.6931472, %v159_v11 }
  0x38   :  { %v75_v16 = vmax.f32 %v72_v13, -100.0 }
  0x39   :  { %v76_v18 = vmax.f32 %v74_v15, -100.0 }
  0x3a   :  { %v77_v21 = vsub.f32 %v67_v12, %v75_v16 }
  0x3b   :  { %v78_v22 = vsub.f32 %v68_v14, %v76_v18 }
  0x3c   :  { %v79_v23 = vmul.f32 %v77_v21, %v61_v17 }
  0x3d   :  { %v80_v24 = vmul.f32 %v78_v22, %v62_v20 }
  0x3e   :  { %v81_v25 = vadd.f32 %v79_v23, %v75_v16 }
  0x3f   :  { %v82_v26 = vadd.f32 %v80_v24, %v76_v18 }
  0x40   :  { %v83_v27 = vsub.f32 0.0, %v81_v25 }
  0x41   :  { %v84_v28 = vsub.f32 0.0, %v82_v26 }
  0x43   :  { %v116_v29 = vsel %vm114_vm2, %v84_v28, 0.0 }
  0x44   :  { %v118_v30 = vadd.f32 %v116_v29, %v83_v27 }
  0x46   :  { %v126_v32 = vmul.f32 %v125_v31, %v118_v30 }
  0x48   :  { %v127_v33 = vmul.f32 0.00048828125, %v126_v32 }
  0x4a   :  { %128 = vst [vmem:[#allocation8] sm:$0xff] %v127_v33 }
  0x4b   :  { %231 = shalt.err (!%p228_p5)
}
  0x4c   :  { %138 = dma.vmem_to_hbm [thread:$0]  %s136_s2, 128, %s287_s3, [#allocation4]  }
  0x4d   :  { %244 = dma.done.wait [#allocation4], 128  }
  0x4e   :  { %245 = vsyncadd [#allocation4], 4294967168 }
  0x4f   :  { %142 = vsyncpa [#allocation3], 1 }
  0x50   :  { %143 = vsyncpa [#allocation6], 1 }
  0x51   :  { %144 = vsyncpa [#allocation4], 1 }

</bundles_post_ra>
